<compile_context>
chip_gen: v5e
topology: v5e:2x2
jax: 0.10.0
libtpu: 0.0.40
codegen_flags: <defaults>
</compile_context>

<pallas_src>
import jax
import jax.numpy as jnp
import numpy as np
from jax.experimental import pallas as pl
from jax.experimental.pallas import tpu as pltpu

EPS = 1e-5                      # GroupNorm eps (PyTorch default)
_SQRT_2_OVER_PI = 0.7978845608028654


# ------------------------------ in-kernel math ------------------------------
def _gelu(x):
    # tanh-approx GELU: one EUP transcendental instead of exp + divide on the VPU.
    # |err| vs exact erf-GELU <= ~3e-3, inside the test tolerance.
    return 0.5 * x * (1.0 + jnp.tanh(_SQRT_2_OVER_PI * (x + 0.044715 * x * x * x)))


def _conv3(h, w_ref, row0, ci, co):
    """Conv1d(kernel=3, padding=1, bias=False) as three tap matmuls.

    h:     (Bt, Lh, ci) f32 activations in NLC layout.
    w_ref: packed weight slab; rows [row0, row0+3*ci) hold the taps in order
           [l-1 | l | l+1], each (ci, co) block = torch_w[:, :, k].T, cols [0, co).
    Shifted taps use zero-padded static slices (per-sample correct, no masks);
    accumulation is f32 via preferred_element_type, operands are bf16 for the MXU.
    """
    bt, lh, _ = h.shape
    m = bt * lh
    z = jnp.zeros((bt, 1, ci), h.dtype)
    h_prev = jnp.concatenate([z, h[:, :lh - 1, :]], axis=1)   # x[l-1], zero pad
    h_next = jnp.concatenate([h[:, 1:, :], z], axis=1)        # x[l+1], zero pad

    def tap(a, k):
        w = w_ref[row0 + k * ci: row0 + (k + 1) * ci, 0:co].astype(jnp.bfloat16)
        return jnp.dot(a.reshape(m, ci).astype(jnp.bfloat16), w,
                       preferred_element_type=jnp.float32)

    y = tap(h_prev, 0) + tap(h, 1) + tap(h_next, 2)           # (m, co) f32
    return y.reshape(bt, lh, co)


def _group_norm(h, gb_ref, row, c):
    """GroupNorm(num_groups=1): per-sample stats over (L, C), single sweep in f32.

    gb_ref rows [row, row+1] hold (gamma, beta), zero-padded to Cmax columns.
    Note: E[x^2]-E[x]^2 form; conv outputs here are near zero-mean so the
    cancellation risk flagged in review is acceptable at f32.
    """
    g = gb_ref[row:row + 1, 0:c].reshape(1, 1, c)
    b = gb_ref[row + 1:row + 2, 0:c].reshape(1, 1, c)
    s1 = jnp.mean(h, axis=(1, 2), keepdims=True)
    s2 = jnp.mean(h * h, axis=(1, 2), keepdims=True)
    inv = jax.lax.rsqrt(s2 - s1 * s1 + EPS)
    return (h - s1) * inv * g + b


# --------------------------------- kernel -----------------------------------
def down_kernel(xp_ref, emb_ref, w_ref, gb_ref, o_ref):
    # xp:  (Bt, Lh, C_in)  bf16, already max-pooled, NLC layout
    # emb: (Bt, 1, C_out)  f32 precomputed SiLU+Linear time embedding
    # w:   (9*C_in + 3*C_out, Cmax) f32 packed conv weights
    # gb:  (8, Cmax) f32 packed GroupNorm gamma/beta
    # o:   (Bt, Lh, C_out) f32
    cin = xp_ref.shape[-1]
    cout = o_ref.shape[-1]

    xp = xp_ref[...].astype(jnp.float32)            # f32 elementwise path

    # --- DoubleConv(C_in, C_in, residual=True) ---
    h = _conv3(xp, w_ref, 0, cin, cin)
    h = _group_norm(h, gb_ref, 0, cin)
    h = _gelu(h)
    h = _conv3(h, w_ref, 3 * cin, cin, cin)
    h = _group_norm(h, gb_ref, 2, cin)
    h = _gelu(xp + h)                               # residual

    # --- DoubleConv(C_in, C_out) ---
    h = _conv3(h, w_ref, 6 * cin, cin, cout)
    h = _group_norm(h, gb_ref, 4, cout)
    h = _gelu(h)
    h = _conv3(h, w_ref, 9 * cin, cout, cout)
    h = _group_norm(h, gb_ref, 6, cout)

    # --- + time embedding, broadcast over length ---
    o_ref[...] = (h + emb_ref[...]).astype(o_ref.dtype)


# --------------------------------- wrapper -----------------------------------
def down_pallas(x, t, params, *, block_b=None):
    """x: (B, C_in, L) f32 (NCL), t: (B_t>=B, emb_dim) f32 -> (B, C_out, L//2) f32."""
    B, C_in, L = x.shape
    Lh = L // 2                                   # MaxPool1d(2) floor behavior
    C_out = params["w2b"].shape[0]
    Cmax = max(C_in, C_out)

    # --- MaxPool1d(2) BEFORE the transpose: one pooled tensor, half the bytes ---
    xp = jnp.max(x[:, :, :2 * Lh].reshape(B, C_in, Lh, 2), axis=-1)     # (B, C_in, Lh)
    xp = jnp.transpose(xp, (0, 2, 1)).astype(jnp.bfloat16)              # (B, Lh, C_in) NLC

    # --- time embedding hoisted: SiLU + Linear as ONE batched matmul ---
    # matches `self.emb_layer(t)[:x.shape[0]]` (t's batch may exceed x's)
    t32 = t[:B].astype(jnp.float32)
    st = t32 * jax.nn.sigmoid(t32)
    emb = (st @ params["w_emb"].T.astype(jnp.float32)
           + params["b_emb"].astype(jnp.float32)).reshape(B, 1, C_out)

    # --- parameter packing: 2 arrays (4 input DMAs total) instead of 12 ---
    def conv_rows(w):   # (co, ci, 3) -> (3*ci, Cmax), rows = [tap l-1 | tap l | tap l+1]
        co, ci, k = w.shape
        r = jnp.transpose(w, (2, 1, 0)).reshape(k * ci, co).astype(jnp.float32)
        return jnp.pad(r, ((0, 0), (0, Cmax - co)))

    w_slab = jnp.concatenate(
        [conv_rows(params["w1a"]), conv_rows(params["w1b"]),
         conv_rows(params["w2a"]), conv_rows(params["w2b"])], axis=0)   # (9Cin+3Cout, Cmax)

    def gb_row(v):
        return jnp.pad(v.astype(jnp.float32), (0, Cmax - v.shape[0]))

    gb = jnp.stack([gb_row(params["g1a"]), gb_row(params["b1a"]),
                    gb_row(params["g1b"]), gb_row(params["b1b"]),
                    gb_row(params["g2a"]), gb_row(params["b2a"]),
                    gb_row(params["g2b"]), gb_row(params["b2b"])], axis=0)  # (8, Cmax)

    # --- batch blocking: fill the MXU M dim, keep >=2 grid steps, fit VMEM ---
    if block_b is None:
        block_b = max(1, pl.cdiv(256, Lh))        # target M = Bt*Lh ~ 256
    # rough per-sample working set: double-buffered bf16 in / f32 out + ~6 live f32 temps
    per_sample = Lh * (2 * 2 * C_in + 2 * 4 * C_out + 6 * 4 * Cmax)
    block_b = min(block_b, max(1, (24 * 2 ** 20) // max(per_sample, 1)))
    Bt = max(1, min(block_b, B))
    if B >= 2:
        Bt = min(Bt, max(1, B // 2))              # >=2 grid steps -> both v7x TCs busy
    Bp = pl.cdiv(B, Bt) * Bt
    if Bp != B:
        pad = Bp - B
        xp = jnp.pad(xp, ((0, pad), (0, 0), (0, 0)))
        emb = jnp.pad(emb, ((0, pad), (0, 0), (0, 0)))

    RW = w_slab.shape[0]
    NGB = gb.shape[0]

    out_nlc = pl.pallas_call(
        down_kernel,
        out_shape=jax.ShapeDtypeStruct((Bp, Lh, C_out), jnp.float32),
        grid=(Bp // Bt,),
        in_specs=[
            pl.BlockSpec((Bt, Lh, C_in), lambda i: (i, 0, 0)),
            pl.BlockSpec((Bt, 1, C_out), lambda i: (i, 0, 0)),
            # constant-index packed params (block index never changes -> no refetch).
            # TODO(synk): pipeline_mode=pl.Buffered(1) would also drop their unused
            # second buffer once verified on this Pallas version.
            pl.BlockSpec((RW, Cmax), lambda i: (0, 0)),
            pl.BlockSpec((NGB, Cmax), lambda i: (0, 0)),
        ],
        out_specs=pl.BlockSpec((Bt, Lh, C_out), lambda i: (i, 0, 0)),
        compiler_params=pltpu.CompilerParams(
            dimension_semantics=("parallel",),
            vmem_limit_bytes=32 * 1024 * 1024,    # <= v7x physical 64 MiB, > v5e default 16 MiB
        ),
    )(xp, emb, w_slab, gb)

    return jnp.transpose(out_nlc[:B], (0, 2, 1))  # (B, C_out, Lh)


# ----------------------------- pure-JAX reference ----------------------------
def _conv1d_ref(x, w):
    return jax.lax.conv_general_dilated(
        x, w, window_strides=(1,), padding=((1, 1),),
        dimension_numbers=("NCH", "OIH", "NCH"),
        precision=jax.lax.Precision.HIGHEST)


def _gn_ref(x, g, b):
    mu = jnp.mean(x, axis=(1, 2), keepdims=True)
    var = jnp.mean((x - mu) ** 2, axis=(1, 2), keepdims=True)
    return (x - mu) / jnp.sqrt(var + EPS) * g[None, :, None] + b[None, :, None]


def _double_conv_ref(x, wa, ga, ba, wb, gb, bb, residual):
    h = _conv1d_ref(x, wa)
    h = _gn_ref(h, ga, ba)
    h = jax.nn.gelu(h, approximate=False)
    h = _conv1d_ref(h, wb)
    h = _gn_ref(h, gb, bb)
    if residual:
        return jax.nn.gelu(x + h, approximate=False)
    return h


def down_ref(x, t, p):
    B, C, L = x.shape
    xp = jnp.max(x[:, :, :2 * (L // 2)].reshape(B, C, L // 2, 2), axis=-1)
    h = _double_conv_ref(xp, p["w1a"], p["g1a"], p["b1a"],
                         p["w1b"], p["g1b"], p["b1b"], residual=True)
    h = _double_conv_ref(h, p["w2a"], p["g2a"], p["b2a"],
                         p["w2b"], p["g2b"], p["b2b"], residual=False)
    st = t[:B] * jax.nn.sigmoid(t[:B])
    emb = st @ p["w_emb"].T + p["b_emb"]
    return h + emb[:, :, None]


# ------------------------------------ main ------------------------------------
if __name__ == "__main__":
    B, C_IN, C_OUT, L, EMB = 2, 4, 8, 16, 64   # small shapes for Down(4, 8, emb_dim=64)

    key = jax.random.PRNGKey(0)
    ks = jax.random.split(key, 16)
    nrm = lambda k, s, sc=0.1: sc * jax.random.normal(k, s, jnp.float32)

    params = {
        "w1a": nrm(ks[0], (C_IN, C_IN, 3), 0.3),
        "g1a": 1.0 + nrm(ks[1], (C_IN,)),
        "b1a": nrm(ks[2], (C_IN,)),
        "w1b": nrm(ks[3], (C_IN, C_IN, 3), 0.3),
        "g1b": 1.0 + nrm(ks[4], (C_IN,)),
        "b1b": nrm(ks[5], (C_IN,)),
        "w2a": nrm(ks[6], (C_OUT, C_IN, 3), 0.3),
        "g2a": 1.0 + nrm(ks[7], (C_OUT,)),
        "b2a": nrm(ks[8], (C_OUT,)),
        "w2b": nrm(ks[9], (C_OUT, C_OUT, 3), 0.3),
        "g2b": 1.0 + nrm(ks[10], (C_OUT,)),
        "b2b": nrm(ks[11], (C_OUT,)),
        "w_emb": nrm(ks[12], (C_OUT, EMB), 0.2),
        "b_emb": nrm(ks[13], (C_OUT,)),
    }
    x = jax.random.normal(ks[14], (B, C_IN, L), jnp.float32)
    t = jax.random.normal(ks[15], (B, EMB), jnp.float32)

    out = jax.jit(down_pallas)(x, t, params)
    out = jax.block_until_ready(out)
    assert out.shape == (B, C_OUT, L // 2), out.shape

    # Kernel runs bf16 activations on the MXU (f32 accumulation) and tanh-GELU;
    # the reference uses f32 HIGHEST convs and exact erf-GELU.  The accumulated
    # divergence across 4 convs + 4 GroupNorms stays well under 5e-2 on these
    # O(1)-scaled outputs.
    ref = jax.block_until_ready(down_ref(x, t, params))
    np.testing.assert_allclose(np.asarray(out), np.asarray(ref), rtol=5e-2, atol=5e-2)

    print("KERNEL_OK")
</pallas_src>

<mosaic_0001>
module attributes {stable_mosaic.version = 11 : i64} {
  func.func @down_kernel(%arg0: i32, %arg1: memref<1x8x4xbf16, #tpu.memory_space<vmem>>, %arg2: memref<1x1x8xf32, #tpu.memory_space<vmem>>, %arg3: memref<60x8xf32, #tpu.memory_space<vmem>>, %arg4: memref<8x8xf32, #tpu.memory_space<vmem>>, %arg5: memref<1x8x8xf32, #tpu.memory_space<vmem>>) attributes {dimension_semantics = [#tpu.dimension_semantics<parallel>], iteration_bounds = array<i64: 2>, scalar_prefetch = 0 : i64, scratch_operands = 0 : i64, tpu.core_type = #tpu.core_type<tc>, window_params = [{transform_indices = @transform_0, window_bounds = array<i64: 1, 8, 4>}, {transform_indices = @transform_1, window_bounds = array<i64: 1, 1, 8>}, {pipeline_mode = #tpu.pipeline_mode<synchronous>, transform_indices = @transform_2, window_bounds = array<i64: 60, 8>}, {pipeline_mode = #tpu.pipeline_mode<synchronous>, transform_indices = @transform_3, window_bounds = array<i64: 8, 8>}, {transform_indices = @transform_4, window_bounds = array<i64: 1, 8, 8>}]} {
    %c0 = arith.constant 0 : index
    %c0_0 = arith.constant 0 : index
    %c0_1 = arith.constant 0 : index
    %0 = vector.load %arg1[%c0, %c0_0, %c0_1] : memref<1x8x4xbf16, #tpu.memory_space<vmem>>, vector<1x8x4xbf16>
    %1 = arith.extf %0 : vector<1x8x4xbf16> to vector<1x8x4xf32>
    %cst = arith.constant 0.000000e+00 : f32
    %2 = vector.broadcast %cst : f32 to vector<1x1x4xf32>
    %3 = vector.extract_strided_slice %1 {offsets = [0, 0, 0], sizes = [1, 7, 4], strides = [1, 1, 1]} : vector<1x8x4xf32> to vector<1x7x4xf32>
    %4 = tpu.concatenate %2, %3 in 1 : vector<1x1x4xf32>, vector<1x7x4xf32> -> vector<1x8x4xf32>
    %5 = vector.extract_strided_slice %1 {offsets = [0, 1, 0], sizes = [1, 7, 4], strides = [1, 1, 1]} : vector<1x8x4xf32> to vector<1x7x4xf32>
    %6 = tpu.concatenate %5, %2 in 1 : vector<1x7x4xf32>, vector<1x1x4xf32> -> vector<1x8x4xf32>
    %c0_2 = arith.constant 0 : index
    %c0_3 = arith.constant 0 : index
    %7 = vector.load %arg3[%c0_2, %c0_3] : memref<60x8xf32, #tpu.memory_space<vmem>>, vector<4x4xf32>
    %8 = arith.truncf %7 : vector<4x4xf32> to vector<4x4xbf16>
    %9 = vector.shape_cast %4 : vector<1x8x4xf32> to vector<8x4xf32>
    %10 = arith.truncf %9 : vector<8x4xf32> to vector<8x4xbf16>
    %cst_4 = arith.constant dense<0.000000e+00> : vector<8x4xf32>
    %11 = tpu.matmul %10, %8, %cst_4 {dimension_numbers = #tpu.dot_dimension_numbers<[1], [0], [0], [1], [0, 0, 1, 1], [], []>} : vector<8x4xbf16>, vector<4x4xbf16>, vector<8x4xf32> -> vector<8x4xf32>
    %c4 = arith.constant 4 : index
    %c0_5 = arith.constant 0 : index
    %12 = vector.load %arg3[%c4, %c0_5] : memref<60x8xf32, #tpu.memory_space<vmem>>, vector<4x4xf32>
    %13 = arith.truncf %12 : vector<4x4xf32> to vector<4x4xbf16>
    %14 = vector.shape_cast %1 : vector<1x8x4xf32> to vector<8x4xf32>
    %15 = arith.truncf %14 : vector<8x4xf32> to vector<8x4xbf16>
    %cst_6 = arith.constant dense<0.000000e+00> : vector<8x4xf32>
    %16 = tpu.matmul %15, %13, %cst_6 {dimension_numbers = #tpu.dot_dimension_numbers<[1], [0], [0], [1], [0, 0, 1, 1], [], []>} : vector<8x4xbf16>, vector<4x4xbf16>, vector<8x4xf32> -> vector<8x4xf32>
    %17 = arith.addf %11, %16 : vector<8x4xf32>
    %c8 = arith.constant 8 : index
    %c0_7 = arith.constant 0 : index
    %18 = vector.load %arg3[%c8, %c0_7] : memref<60x8xf32, #tpu.memory_space<vmem>>, vector<4x4xf32>
    %19 = arith.truncf %18 : vector<4x4xf32> to vector<4x4xbf16>
    %20 = vector.shape_cast %6 : vector<1x8x4xf32> to vector<8x4xf32>
    %21 = arith.truncf %20 : vector<8x4xf32> to vector<8x4xbf16>
    %cst_8 = arith.constant dense<0.000000e+00> : vector<8x4xf32>
    %22 = tpu.matmul %21, %19, %cst_8 {dimension_numbers = #tpu.dot_dimension_numbers<[1], [0], [0], [1], [0, 0, 1, 1], [], []>} : vector<8x4xbf16>, vector<4x4xbf16>, vector<8x4xf32> -> vector<8x4xf32>
    %23 = arith.addf %17, %22 : vector<8x4xf32>
    %24 = vector.shape_cast %23 : vector<8x4xf32> to vector<1x8x4xf32>
    %c0_9 = arith.constant 0 : index
    %c0_10 = arith.constant 0 : index
    %25 = vector.load %arg4[%c0_9, %c0_10] : memref<8x8xf32, #tpu.memory_space<vmem>>, vector<1x4xf32>
    %26 = vector.shape_cast %25 : vector<1x4xf32> to vector<1x1x4xf32>
    %c1 = arith.constant 1 : index
    %c0_11 = arith.constant 0 : index
    %27 = vector.load %arg4[%c1, %c0_11] : memref<8x8xf32, #tpu.memory_space<vmem>>, vector<1x4xf32>
    %28 = vector.shape_cast %27 : vector<1x4xf32> to vector<1x1x4xf32>
    %cst_12 = arith.constant dense<0.000000e+00> : vector<1xf32>
    %29 = vector.multi_reduction <add>, %24, %cst_12 [1, 2] : vector<1x8x4xf32> to vector<1xf32>
    %30 = vector.shape_cast %29 : vector<1xf32> to vector<1x1x1xf32>
    %cst_13 = arith.constant 3.200000e+01 : f32
    %31 = vector.broadcast %cst_13 : f32 to vector<1x1x1xf32>
    %32 = arith.divf %30, %31 : vector<1x1x1xf32>
    %33 = arith.mulf %24, %24 : vector<1x8x4xf32>
    %cst_14 = arith.constant dense<0.000000e+00> : vector<1xf32>
    %34 = vector.multi_reduction <add>, %33, %cst_14 [1, 2] : vector<1x8x4xf32> to vector<1xf32>
    %35 = vector.shape_cast %34 : vector<1xf32> to vector<1x1x1xf32>
    %cst_15 = arith.constant 3.200000e+01 : f32
    %36 = vector.broadcast %cst_15 : f32 to vector<1x1x1xf32>
    %37 = arith.divf %35, %36 : vector<1x1x1xf32>
    %38 = arith.mulf %32, %32 : vector<1x1x1xf32>
    %39 = arith.subf %37, %38 : vector<1x1x1xf32>
    %cst_16 = arith.constant 9.99999974E-6 : f32
    %40 = vector.broadcast %cst_16 : f32 to vector<1x1x1xf32>
    %41 = arith.addf %39, %40 : vector<1x1x1xf32>
    %42 = math.rsqrt %41 : vector<1x1x1xf32>
    %43 = vector.broadcast %32 : vector<1x1x1xf32> to vector<1x8x4xf32>
    %44 = arith.subf %24, %43 : vector<1x8x4xf32>
    %45 = vector.broadcast %42 : vector<1x1x1xf32> to vector<1x8x4xf32>
    %46 = arith.mulf %44, %45 : vector<1x8x4xf32>
    %47 = vector.broadcast %26 : vector<1x1x4xf32> to vector<1x8x4xf32>
    %48 = arith.mulf %46, %47 : vector<1x8x4xf32>
    %49 = vector.broadcast %28 : vector<1x1x4xf32> to vector<1x8x4xf32>
    %50 = arith.addf %48, %49 : vector<1x8x4xf32>
    %cst_17 = arith.constant 5.000000e-01 : f32
    %51 = vector.broadcast %cst_17 : f32 to vector<1x8x4xf32>
    %52 = arith.mulf %51, %50 : vector<1x8x4xf32>
    %cst_18 = arith.constant 4.471500e-02 : f32
    %53 = vector.broadcast %cst_18 : f32 to vector<1x8x4xf32>
    %54 = arith.mulf %53, %50 : vector<1x8x4xf32>
    %55 = arith.mulf %54, %50 : vector<1x8x4xf32>
    %56 = arith.mulf %55, %50 : vector<1x8x4xf32>
    %57 = arith.addf %50, %56 : vector<1x8x4xf32>
    %cst_19 = arith.constant 0.797884583 : f32
    %58 = vector.broadcast %cst_19 : f32 to vector<1x8x4xf32>
    %59 = arith.mulf %58, %57 : vector<1x8x4xf32>
    %60 = math.tanh %59 : vector<1x8x4xf32>
    %cst_20 = arith.constant 1.000000e+00 : f32
    %61 = vector.broadcast %cst_20 : f32 to vector<1x8x4xf32>
    %62 = arith.addf %61, %60 : vector<1x8x4xf32>
    %63 = arith.mulf %52, %62 : vector<1x8x4xf32>
    %cst_21 = arith.constant 0.000000e+00 : f32
    %64 = vector.broadcast %cst_21 : f32 to vector<1x1x4xf32>
    %65 = vector.extract_strided_slice %63 {offsets = [0, 0, 0], sizes = [1, 7, 4], strides = [1, 1, 1]} : vector<1x8x4xf32> to vector<1x7x4xf32>
    %66 = tpu.concatenate %64, %65 in 1 : vector<1x1x4xf32>, vector<1x7x4xf32> -> vector<1x8x4xf32>
    %67 = vector.extract_strided_slice %63 {offsets = [0, 1, 0], sizes = [1, 7, 4], strides = [1, 1, 1]} : vector<1x8x4xf32> to vector<1x7x4xf32>
    %68 = tpu.concatenate %67, %64 in 1 : vector<1x7x4xf32>, vector<1x1x4xf32> -> vector<1x8x4xf32>
    %c12 = arith.constant 12 : index
    %c0_22 = arith.constant 0 : index
    %69 = vector.load %arg3[%c12, %c0_22] : memref<60x8xf32, #tpu.memory_space<vmem>>, vector<4x4xf32>
    %70 = arith.truncf %69 : vector<4x4xf32> to vector<4x4xbf16>
    %71 = vector.shape_cast %66 : vector<1x8x4xf32> to vector<8x4xf32>
    %72 = arith.truncf %71 : vector<8x4xf32> to vector<8x4xbf16>
    %cst_23 = arith.constant dense<0.000000e+00> : vector<8x4xf32>
    %73 = tpu.matmul %72, %70, %cst_23 {dimension_numbers = #tpu.dot_dimension_numbers<[1], [0], [0], [1], [0, 0, 1, 1], [], []>} : vector<8x4xbf16>, vector<4x4xbf16>, vector<8x4xf32> -> vector<8x4xf32>
    %c16 = arith.constant 16 : index
    %c0_24 = arith.constant 0 : index
    %74 = vector.load %arg3[%c16, %c0_24] : memref<60x8xf32, #tpu.memory_space<vmem>>, vector<4x4xf32>
    %75 = arith.truncf %74 : vector<4x4xf32> to vector<4x4xbf16>
    %76 = vector.shape_cast %63 : vector<1x8x4xf32> to vector<8x4xf32>
    %77 = arith.truncf %76 : vector<8x4xf32> to vector<8x4xbf16>
    %cst_25 = arith.constant dense<0.000000e+00> : vector<8x4xf32>
    %78 = tpu.matmul %77, %75, %cst_25 {dimension_numbers = #tpu.dot_dimension_numbers<[1], [0], [0], [1], [0, 0, 1, 1], [], []>} : vector<8x4xbf16>, vector<4x4xbf16>, vector<8x4xf32> -> vector<8x4xf32>
    %79 = arith.addf %73, %78 : vector<8x4xf32>
    %c20 = arith.constant 20 : index
    %c0_26 = arith.constant 0 : index
    %80 = vector.load %arg3[%c20, %c0_26] : memref<60x8xf32, #tpu.memory_space<vmem>>, vector<4x4xf32>
    %81 = arith.truncf %80 : vector<4x4xf32> to vector<4x4xbf16>
    %82 = vector.shape_cast %68 : vector<1x8x4xf32> to vector<8x4xf32>
    %83 = arith.truncf %82 : vector<8x4xf32> to vector<8x4xbf16>
    %cst_27 = arith.constant dense<0.000000e+00> : vector<8x4xf32>
    %84 = tpu.matmul %83, %81, %cst_27 {dimension_numbers = #tpu.dot_dimension_numbers<[1], [0], [0], [1], [0, 0, 1, 1], [], []>} : vector<8x4xbf16>, vector<4x4xbf16>, vector<8x4xf32> -> vector<8x4xf32>
    %85 = arith.addf %79, %84 : vector<8x4xf32>
    %86 = vector.shape_cast %85 : vector<8x4xf32> to vector<1x8x4xf32>
    %c2 = arith.constant 2 : index
    %c0_28 = arith.constant 0 : index
    %87 = vector.load %arg4[%c2, %c0_28] : memref<8x8xf32, #tpu.memory_space<vmem>>, vector<1x4xf32>
    %88 = vector.shape_cast %87 : vector<1x4xf32> to vector<1x1x4xf32>
    %c3 = arith.constant 3 : index
    %c0_29 = arith.constant 0 : index
    %89 = vector.load %arg4[%c3, %c0_29] : memref<8x8xf32, #tpu.memory_space<vmem>>, vector<1x4xf32>
    %90 = vector.shape_cast %89 : vector<1x4xf32> to vector<1x1x4xf32>
    %cst_30 = arith.constant dense<0.000000e+00> : vector<1xf32>
    %91 = vector.multi_reduction <add>, %86, %cst_30 [1, 2] : vector<1x8x4xf32> to vector<1xf32>
    %92 = vector.shape_cast %91 : vector<1xf32> to vector<1x1x1xf32>
    %cst_31 = arith.constant 3.200000e+01 : f32
    %93 = vector.broadcast %cst_31 : f32 to vector<1x1x1xf32>
    %94 = arith.divf %92, %93 : vector<1x1x1xf32>
    %95 = arith.mulf %86, %86 : vector<1x8x4xf32>
    %cst_32 = arith.constant dense<0.000000e+00> : vector<1xf32>
    %96 = vector.multi_reduction <add>, %95, %cst_32 [1, 2] : vector<1x8x4xf32> to vector<1xf32>
    %97 = vector.shape_cast %96 : vector<1xf32> to vector<1x1x1xf32>
    %cst_33 = arith.constant 3.200000e+01 : f32
    %98 = vector.broadcast %cst_33 : f32 to vector<1x1x1xf32>
    %99 = arith.divf %97, %98 : vector<1x1x1xf32>
    %100 = arith.mulf %94, %94 : vector<1x1x1xf32>
    %101 = arith.subf %99, %100 : vector<1x1x1xf32>
    %cst_34 = arith.constant 9.99999974E-6 : f32
    %102 = vector.broadcast %cst_34 : f32 to vector<1x1x1xf32>
    %103 = arith.addf %101, %102 : vector<1x1x1xf32>
    %104 = math.rsqrt %103 : vector<1x1x1xf32>
    %105 = vector.broadcast %94 : vector<1x1x1xf32> to vector<1x8x4xf32>
    %106 = arith.subf %86, %105 : vector<1x8x4xf32>
    %107 = vector.broadcast %104 : vector<1x1x1xf32> to vector<1x8x4xf32>
    %108 = arith.mulf %106, %107 : vector<1x8x4xf32>
    %109 = vector.broadcast %88 : vector<1x1x4xf32> to vector<1x8x4xf32>
    %110 = arith.mulf %108, %109 : vector<1x8x4xf32>
    %111 = vector.broadcast %90 : vector<1x1x4xf32> to vector<1x8x4xf32>
    %112 = arith.addf %110, %111 : vector<1x8x4xf32>
    %113 = arith.addf %1, %112 : vector<1x8x4xf32>
    %cst_35 = arith.constant 5.000000e-01 : f32
    %114 = vector.broadcast %cst_35 : f32 to vector<1x8x4xf32>
    %115 = arith.mulf %114, %113 : vector<1x8x4xf32>
    %cst_36 = arith.constant 4.471500e-02 : f32
    %116 = vector.broadcast %cst_36 : f32 to vector<1x8x4xf32>
    %117 = arith.mulf %116, %113 : vector<1x8x4xf32>
    %118 = arith.mulf %117, %113 : vector<1x8x4xf32>
    %119 = arith.mulf %118, %113 : vector<1x8x4xf32>
    %120 = arith.addf %113, %119 : vector<1x8x4xf32>
    %cst_37 = arith.constant 0.797884583 : f32
    %121 = vector.broadcast %cst_37 : f32 to vector<1x8x4xf32>
    %122 = arith.mulf %121, %120 : vector<1x8x4xf32>
    %123 = math.tanh %122 : vector<1x8x4xf32>
    %cst_38 = arith.constant 1.000000e+00 : f32
    %124 = vector.broadcast %cst_38 : f32 to vector<1x8x4xf32>
    %125 = arith.addf %124, %123 : vector<1x8x4xf32>
    %126 = arith.mulf %115, %125 : vector<1x8x4xf32>
    %cst_39 = arith.constant 0.000000e+00 : f32
    %127 = vector.broadcast %cst_39 : f32 to vector<1x1x4xf32>
    %128 = vector.extract_strided_slice %126 {offsets = [0, 0, 0], sizes = [1, 7, 4], strides = [1, 1, 1]} : vector<1x8x4xf32> to vector<1x7x4xf32>
    %129 = tpu.concatenate %127, %128 in 1 : vector<1x1x4xf32>, vector<1x7x4xf32> -> vector<1x8x4xf32>
    %130 = vector.extract_strided_slice %126 {offsets = [0, 1, 0], sizes = [1, 7, 4], strides = [1, 1, 1]} : vector<1x8x4xf32> to vector<1x7x4xf32>
    %131 = tpu.concatenate %130, %127 in 1 : vector<1x7x4xf32>, vector<1x1x4xf32> -> vector<1x8x4xf32>
    %c24 = arith.constant 24 : index
    %c0_40 = arith.constant 0 : index
    %132 = vector.load %arg3[%c24, %c0_40] : memref<60x8xf32, #tpu.memory_space<vmem>>, vector<4x8xf32>
    %133 = arith.truncf %132 : vector<4x8xf32> to vector<4x8xbf16>
    %134 = vector.shape_cast %129 : vector<1x8x4xf32> to vector<8x4xf32>
    %135 = arith.truncf %134 : vector<8x4xf32> to vector<8x4xbf16>
    %cst_41 = arith.constant dense<0.000000e+00> : vector<8x8xf32>
    %136 = tpu.matmul %135, %133, %cst_41 {dimension_numbers = #tpu.dot_dimension_numbers<[1], [0], [0], [1], [0, 0, 1, 1], [], []>} : vector<8x4xbf16>, vector<4x8xbf16>, vector<8x8xf32> -> vector<8x8xf32>
    %c28 = arith.constant 28 : index
    %c0_42 = arith.constant 0 : index
    %137 = vector.load %arg3[%c28, %c0_42] : memref<60x8xf32, #tpu.memory_space<vmem>>, vector<4x8xf32>
    %138 = arith.truncf %137 : vector<4x8xf32> to vector<4x8xbf16>
    %139 = vector.shape_cast %126 : vector<1x8x4xf32> to vector<8x4xf32>
    %140 = arith.truncf %139 : vector<8x4xf32> to vector<8x4xbf16>
    %cst_43 = arith.constant dense<0.000000e+00> : vector<8x8xf32>
    %141 = tpu.matmul %140, %138, %cst_43 {dimension_numbers = #tpu.dot_dimension_numbers<[1], [0], [0], [1], [0, 0, 1, 1], [], []>} : vector<8x4xbf16>, vector<4x8xbf16>, vector<8x8xf32> -> vector<8x8xf32>
    %142 = arith.addf %136, %141 : vector<8x8xf32>
    %c32 = arith.constant 32 : index
    %c0_44 = arith.constant 0 : index
    %143 = vector.load %arg3[%c32, %c0_44] : memref<60x8xf32, #tpu.memory_space<vmem>>, vector<4x8xf32>
    %144 = arith.truncf %143 : vector<4x8xf32> to vector<4x8xbf16>
    %145 = vector.shape_cast %131 : vector<1x8x4xf32> to vector<8x4xf32>
    %146 = arith.truncf %145 : vector<8x4xf32> to vector<8x4xbf16>
    %cst_45 = arith.constant dense<0.000000e+00> : vector<8x8xf32>
    %147 = tpu.matmul %146, %144, %cst_45 {dimension_numbers = #tpu.dot_dimension_numbers<[1], [0], [0], [1], [0, 0, 1, 1], [], []>} : vector<8x4xbf16>, vector<4x8xbf16>, vector<8x8xf32> -> vector<8x8xf32>
    %148 = arith.addf %142, %147 : vector<8x8xf32>
    %149 = vector.shape_cast %148 : vector<8x8xf32> to vector<1x8x8xf32>
    %c4_46 = arith.constant 4 : index
    %c0_47 = arith.constant 0 : index
    %150 = vector.load %arg4[%c4_46, %c0_47] : memref<8x8xf32, #tpu.memory_space<vmem>>, vector<1x8xf32>
    %151 = vector.shape_cast %150 : vector<1x8xf32> to vector<1x1x8xf32>
    %c5 = arith.constant 5 : index
    %c0_48 = arith.constant 0 : index
    %152 = vector.load %arg4[%c5, %c0_48] : memref<8x8xf32, #tpu.memory_space<vmem>>, vector<1x8xf32>
    %153 = vector.shape_cast %152 : vector<1x8xf32> to vector<1x1x8xf32>
    %cst_49 = arith.constant dense<0.000000e+00> : vector<1xf32>
    %154 = vector.multi_reduction <add>, %149, %cst_49 [1, 2] : vector<1x8x8xf32> to vector<1xf32>
    %155 = vector.shape_cast %154 : vector<1xf32> to vector<1x1x1xf32>
    %cst_50 = arith.constant 6.400000e+01 : f32
    %156 = vector.broadcast %cst_50 : f32 to vector<1x1x1xf32>
    %157 = arith.divf %155, %156 : vector<1x1x1xf32>
    %158 = arith.mulf %149, %149 : vector<1x8x8xf32>
    %cst_51 = arith.constant dense<0.000000e+00> : vector<1xf32>
    %159 = vector.multi_reduction <add>, %158, %cst_51 [1, 2] : vector<1x8x8xf32> to vector<1xf32>
    %160 = vector.shape_cast %159 : vector<1xf32> to vector<1x1x1xf32>
    %cst_52 = arith.constant 6.400000e+01 : f32
    %161 = vector.broadcast %cst_52 : f32 to vector<1x1x1xf32>
    %162 = arith.divf %160, %161 : vector<1x1x1xf32>
    %163 = arith.mulf %157, %157 : vector<1x1x1xf32>
    %164 = arith.subf %162, %163 : vector<1x1x1xf32>
    %cst_53 = arith.constant 9.99999974E-6 : f32
    %165 = vector.broadcast %cst_53 : f32 to vector<1x1x1xf32>
    %166 = arith.addf %164, %165 : vector<1x1x1xf32>
    %167 = math.rsqrt %166 : vector<1x1x1xf32>
    %168 = vector.broadcast %157 : vector<1x1x1xf32> to vector<1x8x8xf32>
    %169 = arith.subf %149, %168 : vector<1x8x8xf32>
    %170 = vector.broadcast %167 : vector<1x1x1xf32> to vector<1x8x8xf32>
    %171 = arith.mulf %169, %170 : vector<1x8x8xf32>
    %172 = vector.broadcast %151 : vector<1x1x8xf32> to vector<1x8x8xf32>
    %173 = arith.mulf %171, %172 : vector<1x8x8xf32>
    %174 = vector.broadcast %153 : vector<1x1x8xf32> to vector<1x8x8xf32>
    %175 = arith.addf %173, %174 : vector<1x8x8xf32>
    %cst_54 = arith.constant 5.000000e-01 : f32
    %176 = vector.broadcast %cst_54 : f32 to vector<1x8x8xf32>
    %177 = arith.mulf %176, %175 : vector<1x8x8xf32>
    %cst_55 = arith.constant 4.471500e-02 : f32
    %178 = vector.broadcast %cst_55 : f32 to vector<1x8x8xf32>
    %179 = arith.mulf %178, %175 : vector<1x8x8xf32>
    %180 = arith.mulf %179, %175 : vector<1x8x8xf32>
    %181 = arith.mulf %180, %175 : vector<1x8x8xf32>
    %182 = arith.addf %175, %181 : vector<1x8x8xf32>
    %cst_56 = arith.constant 0.797884583 : f32
    %183 = vector.broadcast %cst_56 : f32 to vector<1x8x8xf32>
    %184 = arith.mulf %183, %182 : vector<1x8x8xf32>
    %185 = math.tanh %184 : vector<1x8x8xf32>
    %cst_57 = arith.constant 1.000000e+00 : f32
    %186 = vector.broadcast %cst_57 : f32 to vector<1x8x8xf32>
    %187 = arith.addf %186, %185 : vector<1x8x8xf32>
    %188 = arith.mulf %177, %187 : vector<1x8x8xf32>
    %cst_58 = arith.constant 0.000000e+00 : f32
    %189 = vector.broadcast %cst_58 : f32 to vector<1x1x8xf32>
    %190 = vector.extract_strided_slice %188 {offsets = [0, 0, 0], sizes = [1, 7, 8], strides = [1, 1, 1]} : vector<1x8x8xf32> to vector<1x7x8xf32>
    %191 = tpu.concatenate %189, %190 in 1 : vector<1x1x8xf32>, vector<1x7x8xf32> -> vector<1x8x8xf32>
    %192 = vector.extract_strided_slice %188 {offsets = [0, 1, 0], sizes = [1, 7, 8], strides = [1, 1, 1]} : vector<1x8x8xf32> to vector<1x7x8xf32>
    %193 = tpu.concatenate %192, %189 in 1 : vector<1x7x8xf32>, vector<1x1x8xf32> -> vector<1x8x8xf32>
    %c36 = arith.constant 36 : index
    %c0_59 = arith.constant 0 : index
    %194 = vector.load %arg3[%c36, %c0_59] : memref<60x8xf32, #tpu.memory_space<vmem>>, vector<8x8xf32>
    %195 = arith.truncf %194 : vector<8x8xf32> to vector<8x8xbf16>
    %196 = vector.shape_cast %191 : vector<1x8x8xf32> to vector<8x8xf32>
    %197 = arith.truncf %196 : vector<8x8xf32> to vector<8x8xbf16>
    %cst_60 = arith.constant dense<0.000000e+00> : vector<8x8xf32>
    %198 = tpu.matmul %197, %195, %cst_60 {dimension_numbers = #tpu.dot_dimension_numbers<[1], [0], [0], [1], [0, 0, 1, 1], [], []>} : vector<8x8xbf16>, vector<8x8xbf16>, vector<8x8xf32> -> vector<8x8xf32>
    %c44 = arith.constant 44 : index
    %c0_61 = arith.constant 0 : index
    %199 = vector.load %arg3[%c44, %c0_61] : memref<60x8xf32, #tpu.memory_space<vmem>>, vector<8x8xf32>
    %200 = arith.truncf %199 : vector<8x8xf32> to vector<8x8xbf16>
    %201 = vector.shape_cast %188 : vector<1x8x8xf32> to vector<8x8xf32>
    %202 = arith.truncf %201 : vector<8x8xf32> to vector<8x8xbf16>
    %cst_62 = arith.constant dense<0.000000e+00> : vector<8x8xf32>
    %203 = tpu.matmul %202, %200, %cst_62 {dimension_numbers = #tpu.dot_dimension_numbers<[1], [0], [0], [1], [0, 0, 1, 1], [], []>} : vector<8x8xbf16>, vector<8x8xbf16>, vector<8x8xf32> -> vector<8x8xf32>
    %204 = arith.addf %198, %203 : vector<8x8xf32>
    %c52 = arith.constant 52 : index
    %c0_63 = arith.constant 0 : index
    %205 = vector.load %arg3[%c52, %c0_63] : memref<60x8xf32, #tpu.memory_space<vmem>>, vector<8x8xf32>
    %206 = arith.truncf %205 : vector<8x8xf32> to vector<8x8xbf16>
    %207 = vector.shape_cast %193 : vector<1x8x8xf32> to vector<8x8xf32>
    %208 = arith.truncf %207 : vector<8x8xf32> to vector<8x8xbf16>
    %cst_64 = arith.constant dense<0.000000e+00> : vector<8x8xf32>
    %209 = tpu.matmul %208, %206, %cst_64 {dimension_numbers = #tpu.dot_dimension_numbers<[1], [0], [0], [1], [0, 0, 1, 1], [], []>} : vector<8x8xbf16>, vector<8x8xbf16>, vector<8x8xf32> -> vector<8x8xf32>
    %210 = arith.addf %204, %209 : vector<8x8xf32>
    %211 = vector.shape_cast %210 : vector<8x8xf32> to vector<1x8x8xf32>
    %c6 = arith.constant 6 : index
    %c0_65 = arith.constant 0 : index
    %212 = vector.load %arg4[%c6, %c0_65] : memref<8x8xf32, #tpu.memory_space<vmem>>, vector<1x8xf32>
    %213 = vector.shape_cast %212 : vector<1x8xf32> to vector<1x1x8xf32>
    %c7 = arith.constant 7 : index
    %c0_66 = arith.constant 0 : index
    %214 = vector.load %arg4[%c7, %c0_66] : memref<8x8xf32, #tpu.memory_space<vmem>>, vector<1x8xf32>
    %215 = vector.shape_cast %214 : vector<1x8xf32> to vector<1x1x8xf32>
    %cst_67 = arith.constant dense<0.000000e+00> : vector<1xf32>
    %216 = vector.multi_reduction <add>, %211, %cst_67 [1, 2] : vector<1x8x8xf32> to vector<1xf32>
    %217 = vector.shape_cast %216 : vector<1xf32> to vector<1x1x1xf32>
    %cst_68 = arith.constant 6.400000e+01 : f32
    %218 = vector.broadcast %cst_68 : f32 to vector<1x1x1xf32>
    %219 = arith.divf %217, %218 : vector<1x1x1xf32>
    %220 = arith.mulf %211, %211 : vector<1x8x8xf32>
    %cst_69 = arith.constant dense<0.000000e+00> : vector<1xf32>
    %221 = vector.multi_reduction <add>, %220, %cst_69 [1, 2] : vector<1x8x8xf32> to vector<1xf32>
    %222 = vector.shape_cast %221 : vector<1xf32> to vector<1x1x1xf32>
    %cst_70 = arith.constant 6.400000e+01 : f32
    %223 = vector.broadcast %cst_70 : f32 to vector<1x1x1xf32>
    %224 = arith.divf %222, %223 : vector<1x1x1xf32>
    %225 = arith.mulf %219, %219 : vector<1x1x1xf32>
    %226 = arith.subf %224, %225 : vector<1x1x1xf32>
    %cst_71 = arith.constant 9.99999974E-6 : f32
    %227 = vector.broadcast %cst_71 : f32 to vector<1x1x1xf32>
    %228 = arith.addf %226, %227 : vector<1x1x1xf32>
    %229 = math.rsqrt %228 : vector<1x1x1xf32>
    %230 = vector.broadcast %219 : vector<1x1x1xf32> to vector<1x8x8xf32>
    %231 = arith.subf %211, %230 : vector<1x8x8xf32>
    %232 = vector.broadcast %229 : vector<1x1x1xf32> to vector<1x8x8xf32>
    %233 = arith.mulf %231, %232 : vector<1x8x8xf32>
    %234 = vector.broadcast %213 : vector<1x1x8xf32> to vector<1x8x8xf32>
    %235 = arith.mulf %233, %234 : vector<1x8x8xf32>
    %236 = vector.broadcast %215 : vector<1x1x8xf32> to vector<1x8x8xf32>
    %237 = arith.addf %235, %236 : vector<1x8x8xf32>
    %c0_72 = arith.constant 0 : index
    %c0_73 = arith.constant 0 : index
    %c0_74 = arith.constant 0 : index
    %238 = vector.load %arg2[%c0_72, %c0_73, %c0_74] : memref<1x1x8xf32, #tpu.memory_space<vmem>>, vector<1x1x8xf32>
    %239 = vector.broadcast %238 : vector<1x1x8xf32> to vector<1x8x8xf32>
    %240 = arith.addf %237, %239 : vector<1x8x8xf32>
    %c0_75 = arith.constant 0 : index
    %c0_76 = arith.constant 0 : index
    %c0_77 = arith.constant 0 : index
    %241 = vector.load %arg5[%c0_75, %c0_76, %c0_77] : memref<1x8x8xf32, #tpu.memory_space<vmem>>, vector<1x8x8xf32>
    tpu.vector_store %arg5[%c0_75, %c0_76, %c0_77], %240 {strides = array<i32>} : memref<1x8x8xf32, #tpu.memory_space<vmem>>, vector<1x8x8xf32>,
    return
  }
  func.func @transform_0(%arg0: i32) -> (i32, i32, i32) {
    %c0_i32 = arith.constant 0 : i32
    %c0_i32_0 = arith.constant 0 : i32
    %c0_i32_1 = arith.constant 0 : i32
    return %arg0, %c0_i32, %c0_i32_0 : i32, i32, i32
  }
  func.func @transform_1(%arg0: i32) -> (i32, i32, i32) {
    %c0_i32 = arith.constant 0 : i32
    %c0_i32_0 = arith.constant 0 : i32
    %c0_i32_1 = arith.constant 0 : i32
    return %arg0, %c0_i32, %c0_i32_0 : i32, i32, i32
  }
  func.func @transform_2(%arg0: i32) -> (i32, i32) {
    %c0_i32 = arith.constant 0 : i32
    %c0_i32_0 = arith.constant 0 : i32
    %c0_i32_1 = arith.constant 0 : i32
    return %c0_i32, %c0_i32_0 : i32, i32
  }
  func.func @transform_3(%arg0: i32) -> (i32, i32) {
    %c0_i32 = arith.constant 0 : i32
    %c0_i32_0 = arith.constant 0 : i32
    %c0_i32_1 = arith.constant 0 : i32
    return %c0_i32, %c0_i32_0 : i32, i32
  }
  func.func @transform_4(%arg0: i32) -> (i32, i32, i32) {
    %c0_i32 = arith.constant 0 : i32
    %c0_i32_0 = arith.constant 0 : i32
    %c0_i32_1 = arith.constant 0 : i32
    return %arg0, %c0_i32, %c0_i32_0 : i32, i32, i32
  }
}

</mosaic_0001>

<bundles_post_ra>
// kernel: down_pallas.1
= control target key start
LH: loop header
LB: loop body
LE: loop exit
PB: predicated region body
PF: predicated region fallthrough
CT: control target
= control target key end

     0   :  { %s883_s15 = smov 0   ;;  %s1036_s0 = inlined_call_operand.vmem [shape: bf16[2,8,4], index: 0, kind: input, shape index: {}]   ;;  %s1037_s1 = inlined_call_operand.vmem [shape: f32[2,1,8], index: 1, kind: input, shape index: {}]   ;;  %s1038_s2 = inlined_call_operand.vmem [shape: f32[60,8], index: 2, kind: input, shape index: {}]   ;;  %s1039_s3 = inlined_call_operand.vmem [shape: f32[8,8], index: 3, kind: input, shape index: {}]   ;;  %s1040_s4 = inlined_call_operand.vmem [shape: f32[2,8,8], index: 4, kind: output, shape index: {}]  }
   0x1 LB: > { %s790_s16 = sadd.s32 4294967295, %s854_s15   ;;  %p794_p0 = scmp.ge.s32.totalorder %s854_s15, 1  ;;  %s854_s15 = sphi %s883_s15, %s14_s15  }
   0x2   : > { %p169_p1 = scmp.lt.s32.totalorder %s854_s15, 3 }
   0x4   : > { %p170_p2 = pnand %p794_p0, %p169_p1 }
   0x5   : > { %p196_p3 = scmp.lt.s32.totalorder (!%p170_p2), %s790_s16, 1 }
   0x6   : > { %173 = sbr.rel (%p170_p2) target bundleno = 1306 (0x51a), region = 36 }
   0xb   : > { %v222_v0 = vld [vmem:[%s1038_s2 + $0x4] sm:$0xf]  ;;  %vm229_vm0 = vcmask 1041408   ;;  %v219_v2 = vld [vmem:[%s1038_s2] sm:$0xf]  ;;  %s1042_s16 = smov (!%p196_p3, %s790_s16), 1 }
   0xc   : > { %v223_v1 = vpack.c.bf16 %v222_v0, %v222_v0  ;;  %v265_v3 = vld [vmem:[%s1038_s2 + $0x8] sm:$0xf]  ;;  %v220_v4 = vpack.c.bf16 %v219_v2, %v219_v2  ;;  %s795_s23 = sshll.u32 %s1042_s16, 2  ;;  %s202_s26 = scalar_lea.vmem %s1037_s1, %s1042_s16  ;;  %vm225_vm1 = vcmask 31744   ;;  %vm213_vm2 = vcmask 1040384  }
   0xd   : > { %v266_v5 = vpack.c.bf16 %v265_v3, %v265_v3  ;;  %s199_s29 = scalar_lea.vmem %s1036_s0, %s795_s23  ;;  %vm217_vm3 = vcmask 1046528   ;;  %v856_v29 = vmov 32.0   ;;  %v353_v48 = vld [vmem:[%s1038_s2 + $0xc] sm:$0xf]  ;;  %v397_v49 = vld [vmem:[%s1038_s2 + $0x14] sm:$0xf] }
   0xe   : > { %v231_v6 = vsel %vm229_vm0, %v223_v1, 0  ;;  %v250_v7 = vsel %vm229_vm0, %v220_v4, 0  ;;  %v208_v9 = vld [vmem:[%s199_s29] sm:$0xf]  ;;  %830 = vrcp.f32 %v856_v29  ;;  %v356_v50 = vld [vmem:[%s1038_s2 + $0x10] sm:$0xf]  ;;  %v354_v51 = vpack.c.bf16 %v353_v48, %v353_v48 }
   0xf   : > { %240 = vmatpush.bf16.msra.mxu0 %v231_v6  ;;  %v272_v8 = vsel %vm229_vm0, %v266_v5, 0  ;;  %259 = vmatpush.bf16.msra.mxu1 %v250_v7  ;;  %v913_v10 = vunpack.c.l.bf16 %v208_v9  ;;  %v398_v52 = vpack.c.bf16 %v397_v49, %v397_v49  ;;  %v357_v53 = vpack.c.bf16 %v356_v50, %v356_v50  ;;  %v822_v7 = vld [vmem:[%s1039_s3] ss:$0 sm:$0xff]  ;;  %s796_s17 = sshll.u32 %s1042_s16, 3 }
  0x10   : > { %281 = vmatpush.bf16.msra.mxu2 %v272_v8  ;;  %v382_v56 = vsel %vm229_vm0, %v354_v51, 0  ;;  %vm548_vm11 = vcmask 64512   ;;  %vm621_vm13 = vcmask 1043456   ;;  %s206_s22 = scalar_lea.vmem %s1040_s4, %s796_s17 }
  0x11   : > { %v224_v11 = vpack.c.bf16 %v913_v10, %v913_v10  ;;  %v211_v12 = vrot.slane %v913_v10, 7  ;;  %v215_v13 = vrot.slane %v913_v10, 1  ;;  %v404_v57 = vsel %vm229_vm0, %v398_v52, 0 }
  0x12   : > { %v363_v58 = vsel %vm229_vm0, %v357_v53, 0 }
  0x13   : > { %797 = vmatmul.msk.bf16.vlgmr.msra.gmra.mxu0 %vm225_vm1, %v224_v11  ;;  %v214_v14 = vsel %vm213_vm2, 0.0, %v211_v12  ;;  %v218_v15 = vsel %vm217_vm3, %v215_v13, 0.0  ;;  %413 = vmatpush.bf16.msrb.mxu1 %v404_v57  ;;  %v823_v11 = vld [vmem:[%s1039_s3 + $0x1] ss:$0 sm:$0xff]  ;;  %v482_v57 = vld [vmem:[%s1038_s2 + $0x1c] sm:$0xf] }
  0x14   : > { %v221_v16 = vpack.c.bf16 %v214_v14, %v214_v14  ;;  %v267_v17 = vpack.c.bf16 %v218_v15, %v218_v15  ;;  %v831_v30 = vpop.eup %830  ;;  %391 = vmatpush.bf16.msrb.mxu0 %v382_v56  ;;  %372 = vmatpush.bf16.msra.mxu3 %v363_v58  ;;  %v479_v58 = vld [vmem:[%s1038_s2 + $0x18] sm:$0xf] }
  0x15   : > { %v300_v31 = vmul.f32 32.0, %v831_v30  ;;  %vm304_vm4 = vweird.f32 %v831_v30 }
  0x16   : > { %798 = vmatmul.msk.bf16.vlgmr.msra.gmra.mxu1 %vm225_vm1, %v221_v16  ;;  %799 = vmatmul.msk.bf16.vlgmr.msra.gmra.mxu2 %vm225_vm1, %v267_v17 }
  0x17   : > { %v301_v34 = vsub.f32 1.0, %v300_v31 }
  0x19   : > { %v302_v37 = vmul.f32 %v831_v30, %v301_v34 }
  0x1b   : > { %v303_v42 = vadd.f32 %v831_v30, %v302_v37 }
  0x1d   : > { %v926_v46 = vsel %vm304_vm4, %v831_v30, %v303_v42 }
  0x90   : > { %v242_v18 = vpop.f32.mrf.mxu0 }
  0x93   : > { %v261_v19 = vpop.f32.mrf.mxu1 }
  0x94   : > { %v262_v20 = vadd.f32 %v261_v19, %v242_v18 }
  0x98   : > { %v244_v21 = vpop.f32.mrf.mxu0 }
  0x99   : > { %v283_v22 = vpop.f32.mrf.mxu2 }
  0x9a   : > { %v287_v23 = vadd.f32 %v283_v22, %v262_v20 }
  0x9b   : > { %v263_v24 = vpop.f32.mrf.mxu1 }
  0x9c   : > { %v290_v25 = vsel %vm225_vm1, %v287_v23, 0.0  ;;  %v307_v26 = vmul.f32 %v287_v23, %v287_v23 }
  0x9d   : > { %291 = vadd.xlane.f32.xlu0 %v290_v25 }
  0x9e   : > { %v308_v28 = vsel %vm225_vm1, %v307_v26, 0.0 }
  0xa1   : > { %v285_v27 = vpop.f32.mrf.mxu2 }
  0xa5   : > { %309 = vadd.xlane.f32.xlu0 %v308_v28 }
 0x110   : > { %v292_v32 = vpop.xlane.xlu0 %291 }
 0x111   : > { %v293_v33 = vrot.slane %v292_v32, 4 }
 0x113   : > { %v294_v35 = vadd.f32 %v293_v33, %v292_v32 }
 0x115   : > { %v295_v36 = vrot.slane %v294_v35, 2 }
 0x117   : > { %v296_v38 = vadd.f32 %v295_v36, %v294_v35 }
 0x118   : > { %v310_v39 = vpop.xlane.xlu0 %309 }
 0x119   : > { %v297_v40 = vrot.slane %v296_v38, 1  ;;  %v311_v41 = vrot.slane %v310_v39, 4 }
 0x11b   : > { %v312_v43 = vadd.f32 %v311_v41, %v310_v39  ;;  %v298_v44 = vadd.f32 %v297_v40, %v296_v38 }
 0x11d   : > { %v313_v45 = vrot.slane %v312_v43, 2  ;;  %v306_v54 = vmul.f32 %v926_v46, %v298_v44 }
 0x11f   : > { %v314_v47 = vadd.f32 %v313_v45, %v312_v43  ;;  %v318_v60 = vmul.f32 %v306_v54, %v306_v54  ;;  %v331_v6 = vsub.f32 %v287_v23, %v306_v54 }
 0x121   : > { %v315_v55 = vrot.slane %v314_v47, 1 }
 0x123   : > { %v316_v59 = vadd.f32 %v315_v55, %v314_v47 }
 0x125   : > { %v317_v61 = vmul.f32 %v316_v59, %v926_v46  ;;  %v523_v59 = vld [vmem:[%s1038_s2 + $0x20] sm:$0xf] }
 0x127   : > { %v319_v62 = vsub.f32 %v317_v61, %v318_v60  ;;  %v483_v60 = vpack.c.bf16 %v482_v57, %v482_v57  ;;  %v480_v61 = vpack.c.bf16 %v479_v58, %v479_v58 }
 0x129   : > { %v320_v63 = vadd.f32 1e-05, %v319_v62  ;;  %v524_v62 = vpack.c.bf16 %v523_v59, %v523_v59 }
 0x12b   : > { %832 = vrsqrt.f32 %v320_v63  ;;  %vm327_vm6 = vweird.f32 %v320_v63 }
 0x131   : > { %v833_v0 = vpop.eup %832 }
 0x132   : > { %v322_v1 = vmul.f32 %v833_v0, %v320_v63  ;;  %vm328_vm5 = vweird.f32 %v833_v0 }
 0x133   : > { %vm329_vm7 = vmor %vm327_vm6, %vm328_vm5 }
 0x134   : > { %v323_v2 = vmul.f32 %v833_v0, %v322_v1  ;;  %v489_v1 = vsel %vm229_vm0, %v483_v60, 0 }
 0x135   : > { %498 = vmatpush.bf16.msrb.mxu2 %v489_v1 }
 0x136   : > { %v324_v3 = vmul.f32 0.5, %v323_v2  ;;  %v508_v2 = vsel %vm229_vm0, %v480_v61, 0 }
 0x137   : > { %517 = vmatpush.bf16.msrb.mxu3 %v508_v2 }
 0x138   : > { %v325_v4 = vsub.f32 1.5, %v324_v3  ;;  %v530_v3 = vsel %vm229_vm0, %v524_v62, 0 }
 0x139   : > { %539 = vmatpush.bf16.msra.mxu0 %v530_v3 }
 0x13a   : > { %v326_v5 = vmul.f32 %v833_v0, %v325_v4 }
 0x13c   : > { %v330_v8 = vsel %vm329_vm7, %v833_v0, %v326_v5 }
 0x13d   : > { %v332_v9 = vmul.f32 %v331_v6, %v330_v8 }
 0x13f   : > { %v334_v12 = vmul.f32 %v822_v7, %v332_v9 }
 0x141   : > { %v336_v13 = vadd.f32 %v823_v11, %v334_v12 }
 0x143   : > { %v338_v14 = vmul.f32 0.044715, %v336_v13  ;;  %v337_v20 = vmul.f32 0.5, %v336_v13 }
 0x145   : > { %v339_v15 = vmul.f32 %v338_v14, %v336_v13 }
 0x147   : > { %v340_v16 = vmul.f32 %v339_v15, %v336_v13  ;;  %v825_v15 = vld [vmem:[%s1039_s3 + $0x3] ss:$0 sm:$0xff] }
 0x149   : > { %v341_v17 = vadd.f32 %v340_v16, %v336_v13  ;;  %v824_v13 = vld [vmem:[%s1039_s3 + $0x2] ss:$0 sm:$0xff] }
 0x14b   : > { %v342_v18 = vmul.f32 0.7978846, %v341_v17 }
 0x14d   : > { %834 = vtanh.f32 %v342_v18 }
 0x153   : > { %v835_v19 = vpop.eup %834 }
 0x154   : > { %v344_v21 = vadd.f32 1.0, %v835_v19 }
 0x156   : > { %v345_v22 = vmul.f32 %v344_v21, %v337_v20 }
 0x158   : > { %v358_v23 = vpack.c.bf16 %v345_v22, %v345_v22  ;;  %v347_v24 = vrot.slane %v345_v22, 7  ;;  %v350_v25 = vrot.slane %v345_v22, 1 }
 0x15a   : > { %800 = vmatmul.msk.bf16.vlgmr.msra.gmra.mxu3 %vm225_vm1, %v358_v23  ;;  %v349_v26 = vsel %vm213_vm2, 0.0, %v347_v24  ;;  %v352_v27 = vsel %vm217_vm3, %v350_v25, 0.0 }
 0x15b   : > { %v355_v28 = vpack.c.bf16 %v349_v26, %v349_v26  ;;  %v399_v29 = vpack.c.bf16 %v352_v27, %v352_v27 }
 0x15d   : > { %801 = vmatmul.msk.bf16.vlgmr.msrb.gmra.mxu0 %vm225_vm1, %v355_v28  ;;  %802 = vmatmul.msk.bf16.vlgmr.msrb.gmra.mxu1 %vm225_vm1, %v399_v29 }
 0x1da   : > { %v393_v30 = vpop.f32.mrf.mxu0  ;;  %v415_v31 = vpop.f32.mrf.mxu1 }
 0x1dd   : > { %v374_v32 = vpop.f32.mrf.mxu3 }
 0x1de   : > { %v394_v33 = vadd.f32 %v393_v30, %v374_v32 }
 0x1e0   : > { %v419_v34 = vadd.f32 %v415_v31, %v394_v33 }
 0x1e2   : > { %v395_v35 = vpop.f32.mrf.mxu0  ;;  %v417_v36 = vpop.f32.mrf.mxu1  ;;  %v422_v37 = vsel %vm225_vm1, %v419_v34, 0.0  ;;  %v432_v39 = vmul.f32 %v419_v34, %v419_v34 }
 0x1e3   : > { %423 = vadd.xlane.f32.xlu1 %v422_v37 }
 0x1e4   : > { %v433_v40 = vsel %vm225_vm1, %v432_v39, 0.0 }
 0x1e5   : > { %v376_v38 = vpop.f32.mrf.mxu3 }
 0x1eb   : > { %434 = vadd.xlane.f32.xlu1 %v433_v40 }
 0x256   : > { %v424_v41 = vpop.xlane.xlu1 %423 }
 0x257   : > { %v425_v42 = vrot.slane %v424_v41, 4 }
 0x259   : > { %v426_v43 = vadd.f32 %v425_v42, %v424_v41 }
 0x25b   : > { %v427_v44 = vrot.slane %v426_v43, 2 }
 0x25d   : > { %v428_v45 = vadd.f32 %v427_v44, %v426_v43 }
 0x25e   : > { %v435_v47 = vpop.xlane.xlu1 %434 }
 0x25f   : > { %v429_v48 = vrot.slane %v428_v45, 1  ;;  %v436_v49 = vrot.slane %v435_v47, 4 }
 0x261   : > { %v437_v50 = vadd.f32 %v436_v49, %v435_v47  ;;  %v430_v51 = vadd.f32 %v429_v48, %v428_v45  ;;  %v857_v47 = vmov 64.0  }
 0x263   : > { %v438_v52 = vrot.slane %v437_v50, 2  ;;  %v431_v54 = vmul.f32 %v430_v51, %v926_v46 }
 0x265   : > { %v439_v53 = vadd.f32 %v438_v52, %v437_v50  ;;  %v443_v63 = vmul.f32 %v431_v54, %v431_v54 }
 0x267   : > { %v440_v55 = vrot.slane %v439_v53, 1 }
 0x269   : > { %v441_v56 = vadd.f32 %v440_v55, %v439_v53 }
 0x26b   : > { %v442_v0 = vmul.f32 %v441_v56, %v926_v46  ;;  %v456_v46 = vsub.f32 %v419_v34, %v431_v54 }
 0x26d   : > { %v444_v4 = vsub.f32 %v442_v0, %v443_v63 }
 0x26f   : > { %v445_v5 = vadd.f32 1e-05, %v444_v4  ;;  %v612_v4 = vld [vmem:[%s1038_s2 + $0x24] sm:$0xff] }
 0x271   : > { %836 = vrsqrt.f32 %v445_v5  ;;  %vm452_vm9 = vweird.f32 %v445_v5 }
 0x277   : > { %v837_v6 = vpop.eup %836 }
 0x278   : > { %v447_v7 = vmul.f32 %v837_v6, %v445_v5  ;;  %vm453_vm8 = vweird.f32 %v837_v6  ;;  %v657_v5 = vld [vmem:[%s1038_s2 + $0x34] sm:$0xff] }
 0x279   : > { %vm454_vm10 = vmor %vm452_vm9, %vm453_vm8 }
 0x27a   : > { %v448_v8 = vmul.f32 %v837_v6, %v447_v7  ;;  %v613_v7 = vpack.c.bf16 %v612_v4, %v612_v4 }
 0x27c   : > { %v449_v9 = vmul.f32 0.5, %v448_v8  ;;  %v658_v8 = vpack.c.bf16 %v657_v5, %v657_v5 }
 0x27e   : > { %v450_v11 = vsub.f32 1.5, %v449_v9 }
 0x280   : > { %v451_v12 = vmul.f32 %v837_v6, %v450_v11 }
 0x282   : > { %v455_v14 = vsel %vm454_vm10, %v837_v6, %v451_v12  ;;  %v615_v6 = vld [vmem:[%s1038_s2 + $0x2c] sm:$0xff]  ;;  %v642_v12 = vsel %vm621_vm13, %v613_v7, 0 }
 0x283   : > { %v457_v16 = vmul.f32 %v456_v46, %v455_v14  ;;  %v616_v9 = vpack.c.bf16 %v615_v6, %v615_v6  ;;  %v664_v46 = vsel %vm621_vm13, %v658_v8, 0  ;;  %651 = vmatpush.bf16.msra.mxu2 %v642_v12 }
 0x284   : > { %673 = vmatpush.bf16.msra.mxu3 %v664_v46 }
 0x285   : > { %v459_v17 = vmul.f32 %v824_v13, %v457_v16  ;;  %v623_v13 = vsel %vm621_vm13, %v616_v9, 0 }
 0x286   : > { %632 = vmatpush.bf16.msra.mxu1 %v623_v13 }
 0x287   : > { %v461_v18 = vadd.f32 %v825_v15, %v459_v17 }
 0x289   : > { %v462_v19 = vadd.f32 %v461_v18, %v913_v10 }
 0x28b   : > { %v464_v20 = vmul.f32 0.044715, %v462_v19  ;;  %v463_v26 = vmul.f32 0.5, %v462_v19 }
 0x28d   : > { %v465_v21 = vmul.f32 %v464_v20, %v462_v19 }
 0x28f   : > { %v466_v22 = vmul.f32 %v465_v21, %v462_v19 }
 0x291   : > { %v467_v23 = vadd.f32 %v466_v22, %v462_v19 }
 0x293   : > { %v468_v24 = vmul.f32 0.7978846, %v467_v23 }
 0x295   : > { %838 = vtanh.f32 %v468_v24 }
 0x296   : > { %840 = vrcp.f32 %v857_v47 }
 0x29b   : > { %v839_v25 = vpop.eup %838 }
 0x29c   : > { %v470_v27 = vadd.f32 1.0, %v839_v25  ;;  %v841_v48 = vpop.eup %840  ;;  %v826_v25 = vld [vmem:[%s1039_s3 + $0x4] ss:$0 sm:$0xff] }
 0x29d   : > { %v559_v49 = vmul.f32 64.0, %v841_v48  ;;  %vm563_vm12 = vweird.f32 %v841_v48 }
 0x29e   : > { %v471_v28 = vmul.f32 %v470_v27, %v463_v26  ;;  %v827_v27 = vld [vmem:[%s1039_s3 + $0x5] ss:$0 sm:$0xff] }
 0x29f   : > { %v560_v52 = vsub.f32 1.0, %v559_v49 }
 0x2a0   : > { %v484_v29 = vpack.c.bf16 %v471_v28, %v471_v28  ;;  %v473_v30 = vrot.slane %v471_v28, 7  ;;  %v476_v31 = vrot.slane %v471_v28, 1 }
 0x2a1   : > { %v561_v55 = vmul.f32 %v841_v48, %v560_v52 }
 0x2a2   : > { %803 = vmatmul.msk.bf16.vlgmr.msrb.gmra.mxu2 %vm225_vm1, %v484_v29  ;;  %v475_v32 = vsel %vm213_vm2, 0.0, %v473_v30  ;;  %v478_v33 = vsel %vm217_vm3, %v476_v31, 0.0 }
 0x2a3   : > { %v481_v10 = vpack.c.bf16 %v475_v32, %v475_v32  ;;  %v525_v34 = vpack.c.bf16 %v478_v33, %v478_v33  ;;  %v562_v60 = vadd.f32 %v841_v48, %v561_v55 }
 0x2a5   : > { %804 = vmatmul.msk.bf16.vlgmr.msrb.gmra.mxu3 %vm225_vm1, %v481_v10  ;;  %805 = vmatmul.msk.bf16.vlgmr.msra.gmra.mxu0 %vm225_vm1, %v525_v34  ;;  %v988_v0 = vsel %vm563_vm12, %v841_v48, %v562_v60 }
 0x322   : > { %v541_v35 = vpop.f32.mrf.mxu0 }
 0x325   : > { %v500_v36 = vpop.f32.mrf.mxu2 }
 0x328   : > { %v519_v37 = vpop.f32.mrf.mxu3 }
 0x329   : > { %v520_v38 = vadd.f32 %v519_v37, %v500_v36 }
 0x32a   : > { %v543_v39 = vpop.f32.mrf.mxu0 }
 0x32b   : > { %v981_v40 = vadd.f32 %v541_v35, %v520_v38 }
 0x32d   : > { %v502_v41 = vpop.f32.mrf.mxu2  ;;  %v549_v42 = vsel %vm548_vm11, %v981_v40, 0.0  ;;  %v566_v44 = vmul.f32 %v981_v40, %v981_v40 }
 0x32e   : > { %550 = vadd.xlane.f32.xlu2 %v549_v42 }
 0x32f   : > { %v567_v45 = vsel %vm548_vm11, %v566_v44, 0.0 }
 0x330   : > { %v521_v43 = vpop.f32.mrf.mxu3 }
 0x336   : > { %568 = vadd.xlane.f32.xlu2 %v567_v45 }
 0x3a1   : > { %v551_v50 = vpop.xlane.xlu2 %550 }
 0x3a2   : > { %v552_v51 = vrot.slane %v551_v50, 4 }
 0x3a4   : > { %v553_v53 = vadd.f32 %v552_v51, %v551_v50 }
 0x3a6   : > { %v554_v54 = vrot.slane %v553_v53, 2 }
 0x3a8   : > { %v555_v56 = vadd.f32 %v554_v54, %v553_v53 }
 0x3a9   : > { %v569_v57 = vpop.xlane.xlu2 %568 }
 0x3aa   : > { %v556_v58 = vrot.slane %v555_v56, 1  ;;  %v570_v59 = vrot.slane %v569_v57, 4 }
 0x3ac   : > { %v571_v61 = vadd.f32 %v570_v59, %v569_v57  ;;  %v557_v62 = vadd.f32 %v556_v58, %v555_v56 }
 0x3ae   : > { %v572_v63 = vrot.slane %v571_v61, 2  ;;  %v565_v2 = vmul.f32 %v988_v0, %v557_v62 }
 0x3b0   : > { %v573_v1 = vadd.f32 %v572_v63, %v571_v61  ;;  %v577_v14 = vmul.f32 %v565_v2, %v565_v2  ;;  %v590_v24 = vsub.f32 %v981_v40, %v565_v2 }
 0x3b2   : > { %v574_v3 = vrot.slane %v573_v1, 1 }
 0x3b4   : > { %v575_v11 = vadd.f32 %v574_v3, %v573_v1 }
 0x3b6   : > { %v576_v15 = vmul.f32 %v575_v11, %v988_v0 }
 0x3b8   : > { %v578_v16 = vsub.f32 %v576_v15, %v577_v14 }
 0x3ba   : > { %v579_v17 = vadd.f32 1e-05, %v578_v16 }
 0x3bc   : > { %842 = vrsqrt.f32 %v579_v17  ;;  %vm586_vm15 = vweird.f32 %v579_v17 }
 0x3c2   : > { %v843_v18 = vpop.eup %842 }
 0x3c3   : > { %v581_v19 = vmul.f32 %v843_v18, %v579_v17  ;;  %vm587_vm14 = vweird.f32 %v843_v18 }
 0x3c4   : > { %vm588_vm0 = vmor %vm586_vm15, %vm587_vm14 }
 0x3c5   : > { %v582_v20 = vmul.f32 %v843_v18, %v581_v19 }
 0x3c7   : > { %v583_v21 = vmul.f32 0.5, %v582_v20 }
 0x3c9   : > { %v584_v22 = vsub.f32 1.5, %v583_v21  ;;  %v828_v21 = vld [vmem:[%s1039_s3 + $0x6] ss:$0 sm:$0xff] }
 0x3cb   : > { %v585_v23 = vmul.f32 %v843_v18, %v584_v22  ;;  %v829_v22 = vld [vmem:[%s1039_s3 + $0x7] ss:$0 sm:$0xff] }
 0x3cd   : > { %v589_v26 = vsel %vm588_vm0, %v843_v18, %v585_v23 }
 0x3ce   : > { %v591_v28 = vmul.f32 %v590_v24, %v589_v26  ;;  %v821_v24 = vld [vmem:[%s202_s26] ss:$0 sm:$0xff] }
 0x3d0   : > { %v593_v29 = vmul.f32 %v826_v25, %v591_v28 }
 0x3d2   : > { %v595_v30 = vadd.f32 %v827_v27, %v593_v29 }
 0x3d4   : > { %v597_v31 = vmul.f32 0.044715, %v595_v30  ;;  %v596_v36 = vmul.f32 0.5, %v595_v30 }
 0x3d6   : > { %v598_v32 = vmul.f32 %v597_v31, %v595_v30 }
 0x3d8   : > { %v599_v33 = vmul.f32 %v598_v32, %v595_v30 }
 0x3da   : > { %v600_v10 = vadd.f32 %v599_v33, %v595_v30 }
 0x3dc   : > { %v601_v34 = vmul.f32 0.7978846, %v600_v10 }
 0x3de   : > { %844 = vtanh.f32 %v601_v34 }
 0x3e4   : > { %v845_v35 = vpop.eup %844 }
 0x3e5   : > { %v603_v37 = vadd.f32 1.0, %v845_v35 }
 0x3e7   : > { %v604_v38 = vmul.f32 %v603_v37, %v596_v36 }
 0x3e9   : > { %v617_v39 = vpack.c.bf16 %v604_v38, %v604_v38  ;;  %v606_v40 = vrot.slane %v604_v38, 7  ;;  %v609_v41 = vrot.slane %v604_v38, 1 }
 0x3eb   : > { %806 = vmatmul.msk.bf16.vlgmr.msra.gmra.mxu1 %vm548_vm11, %v617_v39  ;;  %v608_v42 = vsel %vm213_vm2, 0.0, %v606_v40  ;;  %v611_v43 = vsel %vm217_vm3, %v609_v41, 0.0 }
 0x3ec   : > { %v614_v44 = vpack.c.bf16 %v608_v42, %v608_v42  ;;  %v659_v45 = vpack.c.bf16 %v611_v43, %v611_v43 }
 0x3ee   : > { %807 = vmatmul.msk.bf16.vlgmr.msra.gmra.mxu2 %vm548_vm11, %v614_v44  ;;  %808 = vmatmul.msk.bf16.vlgmr.msra.gmra.mxu3 %vm548_vm11, %v659_v45 }
 0x468   : > { %v634_v47 = vpop.f32.mrf.mxu1 }
 0x470   : > { %v636_v48 = vpop.f32.mrf.mxu1 }
 0x471   : > { %v653_v49 = vpop.f32.mrf.mxu2  ;;  %v675_v50 = vpop.f32.mrf.mxu3 }
 0x472   : > { %v654_v51 = vadd.f32 %v653_v49, %v634_v47 }
 0x474   : > { %v679_v52 = vadd.f32 %v675_v50, %v654_v51 }
 0x476   : > { %v682_v53 = vsel %vm548_vm11, %v679_v52, 0.0  ;;  %v692_v54 = vmul.f32 %v679_v52, %v679_v52 }
 0x477   : > { %683 = vadd.xlane.f32.xlu0 %v682_v53 }
 0x478   : > { %v693_v55 = vsel %vm548_vm11, %v692_v54, 0.0 }
 0x479   : > { %v655_v56 = vpop.f32.mrf.mxu2  ;;  %v677_v57 = vpop.f32.mrf.mxu3  ;;  %694 = vadd.xlane.f32.xlu1 %v693_v55 }
 0x4ea   : > { %v684_v58 = vpop.xlane.xlu0 %683 }
 0x4eb   : > { %v685_v59 = vrot.slane %v684_v58, 4 }
 0x4ec   : > { %v695_v60 = vpop.xlane.xlu1 %694 }
 0x4ed   : > { %v686_v61 = vadd.f32 %v685_v59, %v684_v58  ;;  %v696_v62 = vrot.slane %v695_v60, 4 }
 0x4ef   : > { %v687_v63 = vrot.slane %v686_v61, 2  ;;  %v697_v1 = vadd.f32 %v696_v62, %v695_v60 }
 0x4f1   : > { %v688_v2 = vadd.f32 %v687_v63, %v686_v61  ;;  %v698_v3 = vrot.slane %v697_v1, 2 }
 0x4f3   : > { %v689_v4 = vrot.slane %v688_v2, 1  ;;  %v699_v5 = vadd.f32 %v698_v3, %v697_v1 }
 0x4f5   : > { %v690_v6 = vadd.f32 %v689_v4, %v688_v2  ;;  %v700_v7 = vrot.slane %v699_v5, 1 }
 0x4f7   : > { %v691_v8 = vmul.f32 %v690_v6, %v988_v0  ;;  %v701_v9 = vadd.f32 %v700_v7, %v699_v5 }
 0x4f9   : > { %v703_v11 = vmul.f32 %v691_v8, %v691_v8  ;;  %v702_v12 = vmul.f32 %v701_v9, %v988_v0  ;;  %v716_v20 = vsub.f32 %v679_v52, %v691_v8 }
 0x4fb   : > { %v704_v46 = vsub.f32 %v702_v12, %v703_v11 }
 0x4fd   : > { %v705_v13 = vadd.f32 1e-05, %v704_v46 }
 0x4ff   : > { %846 = vrsqrt.f32 %v705_v13  ;;  %vm712_vm2 = vweird.f32 %v705_v13 }
 0x505   : > { %v847_v14 = vpop.eup %846 }
 0x506   : > { %v707_v15 = vmul.f32 %v847_v14, %v705_v13  ;;  %vm713_vm1 = vweird.f32 %v847_v14 }
 0x507   : > { %vm714_vm3 = vmor %vm712_vm2, %vm713_vm1 }
 0x508   : > { %v708_v16 = vmul.f32 %v847_v14, %v707_v15 }
 0x50a   : > { %v709_v17 = vmul.f32 0.5, %v708_v16 }
 0x50c   : > { %v710_v18 = vsub.f32 1.5, %v709_v17 }
 0x50e   : > { %v711_v19 = vmul.f32 %v847_v14, %v710_v18 }
 0x510   : > { %v715_v0 = vsel %vm714_vm3, %v847_v14, %v711_v19 }
 0x511   : > { %v717_v23 = vmul.f32 %v716_v20, %v715_v0 }
 0x513   : > { %v719_v25 = vmul.f32 %v828_v21, %v717_v23 }
 0x515   : > { %v721_v26 = vadd.f32 %v829_v22, %v719_v25 }
 0x517   : > { %v726_v27 = vadd.f32 %v821_v24, %v721_v26 }
 0x519   : > { %727 = vst.msk [vmem:[%s206_s22] sm:$0xff] %vm548_vm11, %v726_v27 }
 0x51a PF: > { %s14_s15 = sadd.s32 1, %s854_s15  }
 0x51b   : > { %p11_p4 = scmp.ge.s32.totalorder %s14_s15, 4  }
 0x51d   :  { %13 = sbr.rel (!%p11_p4) target bundleno = 1 (0x1), region = 69 }

</bundles_post_ra>
